<compile_context>
chip_gen: v7x
topology: tpu7x:2x2x1
jax: 0.10.0
libtpu: 0.0.40
codegen_flags: <defaults>
</compile_context>

<pallas_src>
import jax
import jax.numpy as jnp
from jax import lax
from jax.experimental import pallas as pl
from jax.experimental.pallas import tpu as pltpu

_EPS = 1e-12  # matches torch.nn.functional.normalize default eps


def cosine_linear_kernel(x_ref, wt_ref, o_ref):
    """L2-normalize x rows and w^T columns, matmul on MXU, clamp to [-1, 1]."""
    x = x_ref[...]    # (tm, D)  f32
    wt = wt_ref[...]  # (D, Cp)  f32, pre-transposed weight, zero-padded cols

    # Normalize input rows: VPU mul + lane reduce + EUP rsqrt.
    inv_x = lax.rsqrt(
        jnp.maximum(jnp.sum(x * x, axis=-1, keepdims=True), _EPS * _EPS)
    )
    xn = x * inv_x

    # Normalize weight rows == columns of wt. Zero padded columns stay zero
    # (0 * rsqrt(eps^2) = 0).
    inv_w = lax.rsqrt(
        jnp.maximum(jnp.sum(wt * wt, axis=0, keepdims=True), _EPS * _EPS)
    )
    wn = wt * inv_w

    logits = jnp.dot(xn, wn, preferred_element_type=jnp.float32)
    o_ref[...] = jnp.clip(logits, -1.0, 1.0).astype(o_ref.dtype)


def cosine_linear(features, weight):
    """features: (B, D) f32; weight: (C, D) f32 (PyTorch layout) -> (B, C)."""
    B, D = features.shape
    C, Dw = weight.shape
    assert D == Dw

    # Pad class dim to a multiple of 128 -> lane-dense weight tile and
    # unmasked output stores. Padded columns are zero and sliced off below.
    Cp = ((C + 127) // 128) * 128
    if Cp != C:
        w_pad = jnp.zeros((Cp, D), weight.dtype).at[:C, :].set(weight)
    else:
        w_pad = weight
    wt = w_pad.T  # (D, Cp)

    # Pad batch to a multiple of 8 (sublane); tile batch if it is large.
    TM_MAX = 256
    Bp = ((B + 7) // 8) * 8
    if Bp <= TM_MAX:
        tm = Bp
    else:
        tm = TM_MAX
        Bp = ((Bp + tm - 1) // tm) * tm
    if Bp != B:
        x = jnp.zeros((Bp, D), features.dtype).at[:B, :].set(features)
    else:
        x = features

    grid = (Bp // tm,)

    cost = pl.CostEstimate(
        flops=2 * Bp * D * Cp + 3 * (Bp * D + D * Cp),
        transcendentals=Bp + Cp,  # the two rsqrt reductions
        bytes_accessed=4 * (Bp * D + D * Cp + Bp * Cp),
    )

    out = pl.pallas_call(
        cosine_linear_kernel,
        out_shape=jax.ShapeDtypeStruct((Bp, Cp), jnp.float32),
        grid=grid,
        in_specs=[
            pl.BlockSpec((tm, D), lambda i: (i, 0)),   # batch tile
            pl.BlockSpec((D, Cp), lambda i: (0, 0)),   # whole w^T, not re-DMA'd
        ],
        out_specs=pl.BlockSpec((tm, Cp), lambda i: (i, 0)),
        compiler_params=pltpu.CompilerParams(
            dimension_semantics=("parallel",),
        ),
        cost_estimate=cost,
    )(x, wt)

    return out[:B, :C]


if __name__ == "__main__":
    IN_FEATURES = 256
    OUT_FEATURES = 10
    BATCH = 8

    key = jax.random.PRNGKey(0)
    k_x, k_w = jax.random.split(key)

    # Deterministic xavier_uniform_ analog: U(-a, a), a = sqrt(6/(fan_in+fan_out)).
    bound = (6.0 / (IN_FEATURES + OUT_FEATURES)) ** 0.5
    weight = jax.random.uniform(
        k_w, (OUT_FEATURES, IN_FEATURES), jnp.float32, -bound, bound
    )
    features = jax.random.normal(k_x, (BATCH, IN_FEATURES), jnp.float32)

    out = cosine_linear(features, weight)
    out = jax.block_until_ready(out)

    # Reference (== PyTorch forward semantics).
    xn = features / jnp.maximum(
        jnp.linalg.norm(features, axis=1, keepdims=True), _EPS
    )
    wn = weight / jnp.maximum(
        jnp.linalg.norm(weight, axis=1, keepdims=True), _EPS
    )
    ref = jnp.clip(xn @ wn.T, -1.0, 1.0)

    assert out.shape == (BATCH, OUT_FEATURES)
    assert jnp.allclose(out, ref, atol=1e-4, rtol=1e-4)

    print("KERNEL_OK")
</pallas_src>

<mosaic_0001>
module attributes {stable_mosaic.version = 11 : i64} {
  func.func @cosine_linear_kernel(%arg0: i32, %arg1: memref<8x256xf32, #tpu.memory_space<vmem>>, %arg2: memref<256x128xf32, #tpu.memory_space<vmem>>, %arg3: memref<8x128xf32, #tpu.memory_space<vmem>>) attributes {dimension_semantics = [#tpu.dimension_semantics<parallel>], iteration_bounds = array<i64: 1>, scalar_prefetch = 0 : i64, scratch_operands = 0 : i64, tpu.core_type = #tpu.core_type<tc>, window_params = [{transform_indices = @transform_0, window_bounds = array<i64: 8, 256>}, {pipeline_mode = #tpu.pipeline_mode<synchronous>, transform_indices = @transform_1, window_bounds = array<i64: 256, 128>}, {transform_indices = @transform_2, window_bounds = array<i64: 8, 128>}]} {
    %c0 = arith.constant 0 : index
    %c0_0 = arith.constant 0 : index
    %0 = vector.load %arg1[%c0, %c0_0] : memref<8x256xf32, #tpu.memory_space<vmem>>, vector<8x256xf32>
    %c0_1 = arith.constant 0 : index
    %c0_2 = arith.constant 0 : index
    %1 = vector.load %arg2[%c0_1, %c0_2] : memref<256x128xf32, #tpu.memory_space<vmem>>, vector<256x128xf32>
    %2 = arith.mulf %0, %0 : vector<8x256xf32>
    %cst = arith.constant dense<0.000000e+00> : vector<8xf32>
    %3 = vector.multi_reduction <add>, %2, %cst [1] : vector<8x256xf32> to vector<8xf32>
    %4 = vector.shape_cast %3 : vector<8xf32> to vector<8x1xf32>
    %cst_3 = arith.constant 1.000000e-24 : f32
    %5 = vector.broadcast %cst_3 : f32 to vector<8x1xf32>
    %6 = arith.maximumf %4, %5 : vector<8x1xf32>
    %7 = math.rsqrt %6 : vector<8x1xf32>
    %8 = vector.broadcast %7 : vector<8x1xf32> to vector<8x256xf32>
    %9 = arith.mulf %0, %8 : vector<8x256xf32>
    %10 = arith.mulf %1, %1 : vector<256x128xf32>
    %cst_4 = arith.constant dense<0.000000e+00> : vector<128xf32>
    %11 = vector.multi_reduction <add>, %10, %cst_4 [0] : vector<256x128xf32> to vector<128xf32>
    %12 = vector.shape_cast %11 : vector<128xf32> to vector<1x128xf32>
    %cst_5 = arith.constant 1.000000e-24 : f32
    %13 = vector.broadcast %cst_5 : f32 to vector<1x128xf32>
    %14 = arith.maximumf %12, %13 : vector<1x128xf32>
    %15 = math.rsqrt %14 : vector<1x128xf32>
    %16 = vector.broadcast %15 : vector<1x128xf32> to vector<256x128xf32>
    %17 = arith.mulf %1, %16 : vector<256x128xf32>
    %cst_6 = arith.constant dense<0.000000e+00> : vector<8x128xf32>
    %18 = tpu.matmul %9, %17, %cst_6 {dimension_numbers = #tpu.dot_dimension_numbers<[1], [0], [0], [1], [0, 0, 1, 1], [], []>} : vector<8x256xf32>, vector<256x128xf32>, vector<8x128xf32> -> vector<8x128xf32>
    %cst_7 = arith.constant -1.000000e+00 : f32
    %cst_8 = arith.constant 1.000000e+00 : f32
    %19 = vector.broadcast %cst_7 : f32 to vector<8x128xf32>
    %20 = arith.maximumf %19, %18 : vector<8x128xf32>
    %21 = vector.broadcast %cst_8 : f32 to vector<8x128xf32>
    %22 = arith.minimumf %21, %20 : vector<8x128xf32>
    %c0_9 = arith.constant 0 : index
    %c0_10 = arith.constant 0 : index
    %23 = vector.load %arg3[%c0_9, %c0_10] : memref<8x128xf32, #tpu.memory_space<vmem>>, vector<8x128xf32>
    tpu.vector_store %arg3[%c0_9, %c0_10], %22 {strides = array<i32>} : memref<8x128xf32, #tpu.memory_space<vmem>>, vector<8x128xf32>,
    return
  }
  func.func @transform_0(%arg0: i32) -> (i32, i32) {
    %c0_i32 = arith.constant 0 : i32
    %c0_i32_0 = arith.constant 0 : i32
    return %arg0, %c0_i32 : i32, i32
  }
  func.func @transform_1(%arg0: i32) -> (i32, i32) {
    %c0_i32 = arith.constant 0 : i32
    %c0_i32_0 = arith.constant 0 : i32
    %c0_i32_1 = arith.constant 0 : i32
    return %c0_i32, %c0_i32_0 : i32, i32
  }
  func.func @transform_2(%arg0: i32) -> (i32, i32) {
    %c0_i32 = arith.constant 0 : i32
    %c0_i32_0 = arith.constant 0 : i32
    return %arg0, %c0_i32 : i32, i32
  }
}

</mosaic_0001>

<bundles_post_ra>
// kernel: tpu_custom_call.1
= control target key start
LH: loop header
LB: loop body
LE: loop exit
PB: predicated region body
PF: predicated region fallthrough
CT: control target
= control target key end

     0   :  { %7 = vsyncpa [#allocation3], 0  ;;  %s620_s0 = inlined_call_operand.hbm [shape: f32[8,256], index: 0, kind: input, shape index: {}]   ;;  %s621_s1 = inlined_call_operand.hbm [shape: f32[256,128], index: 1, kind: input, shape index: {}]   ;;  %s622_s2 = inlined_call_operand.hbm [shape: f32[8,128], index: 2, kind: output, shape index: {}]  }
   0x1   :  { %8 = vsyncpa [#allocation6], 0 }
   0x2   :  { %9 = vsyncpa [#allocation4], 0  ;;  %s422_s9 = smov [#allocation2]   ;;  %s423_s11 = smov [#allocation5]  }
   0x3   :  { %s16_s10 = sshll.u32 %s422_s9, 4  ;;  %s25_s12 = sshll.u32 %s423_s11, 4  ;;  %s17_s10 = int_to_ptr.vmem [resolvable:$true] %s16_s10  ;;  %s442_s12 = int_to_ptr.vmem [resolvable:$true] %s25_s12 }
   0x4   :  { %s350_s15 = scalar_lea.hbm %s620_s0, 256 }
   0x5   :  { %p351_p0 = scmp.ne.s32.totalorder %s620_s0, %s350_s15  ;;  %p354_p1 = scmp.lt.u32.totalorder %s350_s15, %s620_s0 }
   0x7   :  { %p356_p2 = pnand %p354_p1, %p351_p0 }
   0x9   :  { %359 = shalt.err (!%p356_p2)
}
   0xa   :  { %s360_s20 = scalar_lea.vmem %s17_s10, 256  ;;  %p365_p4 = scmp.lt.s32.totalorder %s17_s10, %s17_s10 }
   0xb   :  { %p361_p3 = scmp.ne.s32.totalorder %s17_s10, %s360_s20  ;;  %p366_p5 = scmp.lt.s32.totalorder %s360_s20, %s360_s20 }
   0xd   :  { %p367_p6 = por %p366_p5, %p365_p4 }
   0xf   :  { %p368_p7 = pnand %p367_p6, %p361_p3 }
  0x11   :  { %371 = shalt.err (!%p368_p7)
}
  0x12   :  { %19 = dma.hbm_to_vmem [thread:$0]  %s620_s0, 256, %s17_s10, [#allocation3]  }
  0x13   :  { %s372_s25 = scalar_lea.hbm %s621_s1, 4096 }
  0x14   :  { %p373_p8 = scmp.ne.s32.totalorder %s621_s1, %s372_s25  ;;  %p376_p9 = scmp.lt.u32.totalorder %s372_s25, %s621_s1 }
  0x16   :  { %p378_p10 = pnand %p376_p9, %p373_p8 }
  0x18   :  { %381 = shalt.err (!%p378_p10)
}
  0x19   :  { %s382_s30 = scalar_lea.vmem %s442_s12, 4096  ;;  %p387_p12 = scmp.lt.s32.totalorder %s442_s12, %s442_s12 }
  0x1a   :  { %p383_p11 = scmp.ne.s32.totalorder %s442_s12, %s382_s30  ;;  %p388_p13 = scmp.lt.s32.totalorder %s382_s30, %s382_s30 }
  0x1c   :  { %p389_p0 = por %p388_p13, %p387_p12 }
  0x1e   :  { %p390_p1 = pnand %p389_p0, %p383_p11 }
  0x20   :  { %393 = shalt.err (!%p390_p1)
}
  0x21   :  { %s424_s0 = smov 128   ;;  %s425_s3 = smov 8  }
  0x22   :  { %31 = dma.hbm_to_vmem [thread:$0]  %s621_s1, 4096, %s442_s12, [#allocation6], %s424_s0, %s424_s0, %s425_s3  }
  0x23   :  { %416 = dma.done.wait [#allocation3], 256  }
  0x24   :  { %417 = vsyncadd [#allocation3], 4294967040 }
  0x25   :  { %418 = dma.done.wait [#allocation6], 4096  }
  0x26   :  { %419 = vsyncadd [#allocation6], 4294963200  ;;  %v473_v0 = vld [vmem:[#allocation2] sm:$0xff]  ;;  %v475_v1 = vld [vmem:[#allocation2 + $0x8] sm:$0xff]  ;;  %s426_s1 = smov [#allocation7]  }
  0x27   :  { %v477_v2 = vld [vmem:[#allocation5] sm:$0xff]  ;;  %v72_v3 = vmul.f32 %v473_v0, %v473_v0  ;;  %v73_v4 = vmul.f32 %v475_v1, %v475_v1  ;;  %v483_v5 = vld [vmem:[#allocation5 + $0x8] sm:$0xff]  ;;  %v485_v6 = vld [vmem:[#allocation5 + $0x10] sm:$0xff]  ;;  %s263_s6 = sshll.u32 %s426_s1, 4  ;;  %s264_s6 = int_to_ptr.vmem [resolvable:$true] %s263_s6 }
  0x28   :  { %v487_v7 = vld [vmem:[#allocation5 + $0x18] sm:$0xff]  ;;  %v81_v8 = vmul.f32 %v477_v2, %v477_v2  ;;  %v82_v9 = vmul.f32 %v483_v5, %v483_v5  ;;  %v83_v10 = vmul.f32 %v485_v6, %v485_v6  ;;  %v495_v12 = vld [vmem:[#allocation5 + $0x20] sm:$0xff]  ;;  %v499_v15 = vld [vmem:[#allocation5 + $0x28] sm:$0xff]  ;;  %s394_s7 = scalar_lea.vmem %s264_s6, 128  ;;  %p399_p3 = scmp.lt.s32.totalorder %s264_s6, %s264_s6 }
  0x29   :  { %v74_v11 = vadd.f32 %v73_v4, %v72_v3  ;;  %v84_v13 = vmul.f32 %v487_v7, %v487_v7  ;;  %v85_v16 = vmul.f32 %v495_v12, %v495_v12  ;;  %v503_v18 = vld [vmem:[#allocation5 + $0x30] sm:$0xff]  ;;  %v86_v19 = vmul.f32 %v499_v15, %v499_v15  ;;  %v507_v21 = vld [vmem:[#allocation5 + $0x38] sm:$0xff]  ;;  %v511_v24 = vld [vmem:[#allocation5 + $0x40] sm:$0xff]  ;;  %p395_p2 = scmp.ne.s32.totalorder %s264_s6, %s394_s7  ;;  %p400_p4 = scmp.lt.s32.totalorder %s394_s7, %s394_s7 }
  0x2a   :  { %v113_v14 = vadd.f32 %v82_v9, %v81_v8  ;;  %v87_v22 = vmul.f32 %v503_v18, %v503_v18  ;;  %v88_v25 = vmul.f32 %v507_v21, %v507_v21  ;;  %v515_v27 = vld [vmem:[#allocation5 + $0x48] sm:$0xff]  ;;  %v89_v28 = vmul.f32 %v511_v24, %v511_v24  ;;  %v519_v30 = vld [vmem:[#allocation5 + $0x50] sm:$0xff]  ;;  %v523_v33 = vld [vmem:[#allocation5 + $0x58] sm:$0xff] }
  0x2b   :  { %75 = vadd.xlane.f32.xlu0 %v74_v11  ;;  %v90_v31 = vmul.f32 %v515_v27, %v515_v27  ;;  %v91_v34 = vmul.f32 %v519_v30, %v519_v30  ;;  %v527_v36 = vld [vmem:[#allocation5 + $0x60] sm:$0xff]  ;;  %v92_v37 = vmul.f32 %v523_v33, %v523_v33  ;;  %v531_v39 = vld [vmem:[#allocation5 + $0x68] sm:$0xff]  ;;  %v535_v42 = vld [vmem:[#allocation5 + $0x70] sm:$0xff]  ;;  %p401_p5 = por %p400_p4, %p399_p3 }
  0x2c   :  { %v114_v17 = vadd.f32 %v113_v14, %v83_v10  ;;  %v93_v40 = vmul.f32 %v527_v36, %v527_v36  ;;  %v94_v43 = vmul.f32 %v531_v39, %v531_v39  ;;  %v539_v45 = vld [vmem:[#allocation5 + $0x78] sm:$0xff]  ;;  %v95_v46 = vmul.f32 %v535_v42, %v535_v42  ;;  %v56_v48 = vld [vmem:[#allocation5 + $0x80] sm:$0xff]  ;;  %v57_v51 = vld [vmem:[#allocation5 + $0x88] sm:$0xff] }
  0x2d   :  { %v96_v49 = vmul.f32 %v539_v45, %v539_v45  ;;  %v97_v52 = vmul.f32 %v56_v48, %v56_v48  ;;  %v58_v54 = vld [vmem:[#allocation5 + $0x90] sm:$0xff]  ;;  %v98_v55 = vmul.f32 %v57_v51, %v57_v51  ;;  %v59_v57 = vld [vmem:[#allocation5 + $0x98] sm:$0xff]  ;;  %v60_v60 = vld [vmem:[#allocation5 + $0xa0] sm:$0xff]  ;;  %p402_p6 = pnand %p401_p5, %p395_p2 }
  0x2e   :  { %v115_v20 = vadd.f32 %v114_v17, %v84_v13  ;;  %v99_v58 = vmul.f32 %v58_v54, %v58_v54  ;;  %v100_v61 = vmul.f32 %v59_v57, %v59_v57  ;;  %v61_v63 = vld [vmem:[#allocation5 + $0xa8] sm:$0xff]  ;;  %v101_v3 = vmul.f32 %v60_v60, %v60_v60  ;;  %v545_v8 = vld [vmem:[#allocation5 + $0xb0] sm:$0xff]  ;;  %v63_v11 = vld [vmem:[#allocation5 + $0xb8] sm:$0xff] }
  0x2f   :  { %v102_v9 = vmul.f32 %v61_v63, %v61_v63  ;;  %v103_v13 = vmul.f32 %v545_v8, %v545_v8  ;;  %v104_v17 = vmul.f32 %v63_v11, %v63_v11 }
  0x30   :  { %v116_v23 = vadd.f32 %v115_v20, %v85_v16  ;;  %v549_v16 = vld [vmem:[#allocation5 + $0xc0] sm:$0xff]  ;;  %v551_v20 = vld [vmem:[#allocation5 + $0xc8] sm:$0xff] }
  0x32   :  { %v117_v26 = vadd.f32 %v116_v23, %v86_v19 }
  0x34   :  { %v118_v29 = vadd.f32 %v117_v26, %v87_v22  ;;  %v105_v22 = vmul.f32 %v549_v16, %v549_v16  ;;  %v106_v26 = vmul.f32 %v551_v20, %v551_v20 }
  0x36   :  { %v119_v32 = vadd.f32 %v118_v29, %v88_v25  ;;  %v555_v25 = vld [vmem:[#allocation5 + $0xd0] sm:$0xff]  ;;  %v559_v29 = vld [vmem:[#allocation5 + $0xd8] sm:$0xff] }
  0x38   :  { %v120_v35 = vadd.f32 %v119_v32, %v89_v28 }
  0x3a   :  { %v121_v38 = vadd.f32 %v120_v35, %v90_v31  ;;  %v107_v31 = vmul.f32 %v555_v25, %v555_v25  ;;  %v108_v35 = vmul.f32 %v559_v29, %v559_v29 }
  0x3c   :  { %v122_v41 = vadd.f32 %v121_v38, %v91_v34  ;;  %v563_v34 = vld [vmem:[#allocation5 + $0xe0] sm:$0xff]  ;;  %v567_v38 = vld [vmem:[#allocation5 + $0xe8] sm:$0xff] }
  0x3e   :  { %v123_v44 = vadd.f32 %v122_v41, %v92_v37 }
  0x40   :  { %v124_v47 = vadd.f32 %v123_v44, %v93_v40  ;;  %v109_v40 = vmul.f32 %v563_v34, %v563_v34  ;;  %v110_v44 = vmul.f32 %v567_v38, %v567_v38 }
  0x42   :  { %v125_v50 = vadd.f32 %v124_v47, %v94_v43  ;;  %v571_v43 = vld [vmem:[#allocation5 + $0xf0] sm:$0xff]  ;;  %v575_v47 = vld [vmem:[#allocation5 + $0xf8] sm:$0xff] }
  0x44   :  { %v126_v53 = vadd.f32 %v125_v50, %v95_v46 }
  0x46   :  { %v127_v56 = vadd.f32 %v126_v53, %v96_v49  ;;  %v111_v49 = vmul.f32 %v571_v43, %v571_v43 }
  0x48   :  { %v128_v59 = vadd.f32 %v127_v56, %v97_v52  ;;  %v112_v52 = vmul.f32 %v575_v47, %v575_v47 }
  0x4a   :  { %v129_v62 = vadd.f32 %v128_v59, %v98_v55 }
  0x4c   :  { %v130_v4 = vadd.f32 %v129_v62, %v99_v58 }
  0x4e   :  { %v131_v10 = vadd.f32 %v130_v4, %v100_v61 }
  0x50   :  { %v132_v14 = vadd.f32 %v131_v10, %v101_v3 }
  0x52   :  { %v133_v19 = vadd.f32 %v132_v14, %v102_v9 }
  0x54   :  { %v134_v23 = vadd.f32 %v133_v19, %v103_v13 }
  0x56   :  { %v135_v28 = vadd.f32 %v134_v23, %v104_v17 }
  0x58   :  { %v136_v32 = vadd.f32 %v135_v28, %v105_v22 }
  0x5a   :  { %v137_v37 = vadd.f32 %v136_v32, %v106_v26 }
  0x5c   :  { %v138_v41 = vadd.f32 %v137_v37, %v107_v31 }
  0x5e   :  { %v139_v46 = vadd.f32 %v138_v41, %v108_v35 }
  0x60   :  { %v140_v50 = vadd.f32 %v139_v46, %v109_v40 }
  0x62   :  { %v141_v53 = vadd.f32 %v140_v50, %v110_v44 }
  0x64   :  { %v142_v55 = vadd.f32 %v141_v53, %v111_v49 }
  0x66   :  { %v143_v56 = vadd.f32 %v142_v55, %v112_v52 }
  0x68   :  { %v144_v58 = vrot.slane %v143_v56, 4 }
  0x6a   :  { %v145_v59 = vadd.f32 %v144_v58, %v143_v56 }
  0x6c   :  { %v146_v61 = vrot.slane %v145_v59, 2 }
  0x6e   :  { %v147_v62 = vadd.f32 %v146_v61, %v145_v59 }
  0x70   :  { %v148_v3 = vrot.slane %v147_v62, 1 }
  0x72   :  { %v149_v4 = vadd.f32 %v148_v3, %v147_v62 }
  0x74   :  { %v150_v9 = vmax.f32 %v149_v4, 1e-24 }
  0x76   :  { %346 = vrsqrt.f32 %v150_v9 }
  0x80   :  { %v347_v10 = vpop.eup %346 }
  0x81   :  { %v168_v13 = vmul.f32 %v347_v10, %v56_v48  ;;  %v169_v14 = vmul.f32 %v347_v10, %v57_v51  ;;  %v152_v17 = vmul.f32 %v347_v10, %v477_v2  ;;  %v153_v19 = vmul.f32 %v347_v10, %v483_v5 }
  0x82   :  { %v170_v22 = vmul.f32 %v347_v10, %v58_v54  ;;  %v171_v23 = vmul.f32 %v347_v10, %v59_v57  ;;  %v154_v26 = vmul.f32 %v347_v10, %v485_v6  ;;  %v155_v28 = vmul.f32 %v347_v10, %v487_v7 }
  0x83   :  { %v309_v31 = vpack.c.bf16 %v169_v14, %v168_v13  ;;  %v311_v32 = vpack.c.bf16 %v153_v19, %v152_v17  ;;  %v172_v35 = vmul.f32 %v347_v10, %v60_v60  ;;  %v173_v37 = vmul.f32 %v347_v10, %v61_v63 }
  0x84   :  { %v313_v40 = vpack.c.bf16 %v171_v23, %v170_v22  ;;  %v315_v41 = vpack.c.bf16 %v155_v28, %v154_v26  ;;  %v156_v48 = vmul.f32 %v347_v10, %v495_v12  ;;  %v157_v2 = vmul.f32 %v347_v10, %v499_v15 }
  0x85   :  { %310 = vmatprep.subr.bf16.mxu0 %v309_v31  ;;  %v317_v5 = vpack.c.bf16 %v173_v37, %v172_v35  ;;  %v174_v51 = vmul.f32 %v347_v10, %v545_v8  ;;  %v175_v54 = vmul.f32 %v347_v10, %v63_v11  ;;  %v158_v7 = vmul.f32 %v347_v10, %v503_v18 }
  0x86   :  { %312 = vmatpush3.bf16.msra.mxu0 %v311_v32  ;;  %v319_v6 = vpack.c.bf16 %v157_v2, %v156_v48  ;;  %v159_v57 = vmul.f32 %v347_v10, %v507_v21  ;;  %v176_v63 = vmul.f32 %v347_v10, %v549_v16  ;;  %v177_v44 = vmul.f32 %v347_v10, %v551_v20 }
  0x87   :  { %314 = vmatprep.subr.bf16.mxu0 %v313_v40  ;;  %v321_v60 = vpack.c.bf16 %v175_v54, %v174_v51  ;;  %v160_v15 = vmul.f32 %v347_v10, %v511_v24  ;;  %v161_v46 = vmul.f32 %v347_v10, %v515_v27  ;;  %v178_v11 = vmul.f32 %v347_v10, %v555_v25 }
  0x88   :  { %v323_v12 = vpack.c.bf16 %v159_v57, %v158_v7  ;;  %v325_v8 = vpack.c.bf16 %v177_v44, %v176_v63  ;;  %v179_v18 = vmul.f32 %v347_v10, %v559_v29  ;;  %v162_v49 = vmul.f32 %v347_v10, %v519_v30 }
  0x89   :  { %v327_v21 = vpack.c.bf16 %v161_v46, %v160_v15  ;;  %v163_v16 = vmul.f32 %v347_v10, %v523_v33  ;;  %v180_v50 = vmul.f32 %v347_v10, %v563_v34  ;;  %v181_v24 = vmul.f32 %v347_v10, %v567_v38 }
  0x8a   :  { %316 = vmatpush3.bf16.msra.mxu0 %v315_v41  ;;  %v329_v20 = vpack.c.bf16 %v179_v18, %v178_v11  ;;  %v164_v52 = vmul.f32 %v347_v10, %v527_v36  ;;  %v165_v25 = vmul.f32 %v347_v10, %v531_v39  ;;  %v182_v53 = vmul.f32 %v347_v10, %v571_v43 }
  0x8b   :  { %318 = vmatprep.subr.bf16.mxu0 %v317_v5  ;;  %v331_v27 = vpack.c.bf16 %v163_v16, %v162_v49  ;;  %v333_v29 = vpack.c.bf16 %v181_v24, %v180_v50  ;;  %v183_v30 = vmul.f32 %v347_v10, %v575_v47  ;;  %v166_v55 = vmul.f32 %v347_v10, %v535_v42 }
  0x8c   :  { %v335_v33 = vpack.c.bf16 %v165_v25, %v164_v52  ;;  %v167_v34 = vmul.f32 %v347_v10, %v539_v45 }
  0x8d   :  { %v337_v38 = vpack.c.bf16 %v183_v30, %v182_v53 }
  0x8e   :  { %320 = vmatpush3.bf16.msra.mxu0 %v319_v6  ;;  %v339_v56 = vpack.c.bf16 %v167_v34, %v166_v55 }
  0x8f   :  { %322 = vmatprep.subr.bf16.mxu0 %v321_v60 }
  0x92   :  { %324 = vmatpush3.bf16.msra.mxu0 %v323_v12 }
  0x93   :  { %326 = vmatprep.subr.bf16.mxu0 %v325_v8 }
  0x96   :  { %328 = vmatpush3.bf16.msra.mxu0 %v327_v21 }
  0x97   :  { %330 = vmatprep.subr.bf16.mxu0 %v329_v20 }
  0x9a   :  { %332 = vmatpush3.bf16.msra.mxu0 %v331_v27 }
  0x9b   :  { %334 = vmatprep.subr.bf16.mxu0 %v333_v29 }
  0x9e   :  { %336 = vmatpush3.bf16.msra.mxu0 %v335_v33 }
  0x9f   :  { %338 = vmatprep.subr.bf16.mxu0 %v337_v38 }
  0xa2   :  { %340 = vmatpush3.bf16.msra.mxu0 %v339_v56 }
  0xb8   :  { %v76_v36 = vpop.xlane.xlu0 %75 }
  0xb9   :  { %v77_v39 = vmax.f32 %v76_v36, 1e-24 }
  0xbb   :  { %348 = vrsqrt.f32 %v77_v39 }
  0xc5   :  { %v349_v58 = vpop.eup %348 }
  0xc6   :  { %v80_v43 = vmul.f32 %v349_v58, %v475_v1  ;;  %v79_v47 = vmul.f32 %v349_v58, %v473_v0 }
  0xc8   :  { %248 = vmatprep.mubr.f32.mxu0 %v80_v43 }
  0xc9   :  { %249 = vmatmul.mubr.f32.vlgmr.msra.gmra.mrb[0].mxu0 %v79_v47 }
 0x19c   :  { %v306_v59 = vpop.f32.mrb[0].mxu0 }
 0x19d   :  { %v307_v42 = vpop.f32.mrb[1].mxu0 }
 0x19e   :  { %v308_v45 = vadd.f32 %v307_v42, %v306_v59 }
 0x1a0   :  { %v273_v61 = vclamps-f32 %v308_v45, 1.0 }
 0x1a2   :  { %256 = vst [vmem:[#allocation7] sm:$0xff] %v273_v61 }
 0x1a3   :  { %405 = shalt.err (!%p402_p6)
}
 0x1a4   :  { %s406_s10 = scalar_lea.hbm %s622_s2, 128 }
 0x1a5   :  { %p407_p7 = scmp.ne.s32.totalorder %s622_s2, %s406_s10  ;;  %p410_p8 = scmp.lt.u32.totalorder %s406_s10, %s622_s2 }
 0x1a7   :  { %p412_p9 = pnand %p410_p8, %p407_p7 }
 0x1a9   :  { %415 = shalt.err (!%p412_p9)
}
 0x1aa   :  { %266 = dma.vmem_to_hbm [thread:$0]  %s264_s6, 128, %s622_s2, [#allocation4]  }
 0x1ab   :  { %420 = dma.done.wait [#allocation4], 128  }
 0x1ac   :  { %421 = vsyncadd [#allocation4], 4294967168 }
 0x1ad   :  { %270 = vsyncpa [#allocation3], 1 }
 0x1ae   :  { %271 = vsyncpa [#allocation6], 1 }
 0x1af   :  { %272 = vsyncpa [#allocation4], 1 }

</bundles_post_ra>
